<compile_context>
chip_gen: v7x
topology: tpu7x:2x2x1
jax: 0.10.0
libtpu: 0.0.40
codegen_flags: <defaults>
</compile_context>

<pallas_src>
import jax
import jax.numpy as jnp
from jax import lax
from jax.experimental import pallas as pl
from jax.experimental.pallas import tpu as pltpu


def _round_up(x: int, m: int) -> int:
    return ((x + m - 1) // m) * m


def _fbn_kernel(x_ref, p_ref, o_ref):
    # x_ref: (TR, TW) activation tile; p_ref: (TR, 2) packed [scale, shift] in f32.
    x = x_ref[...].astype(jnp.float32)
    p = p_ref[...]
    scale = p[:, 0:1]          # (TR, 1), broadcast over lanes
    shift = p[:, 1:2]          # (TR, 1)
    o_ref[...] = (x * scale + shift).astype(o_ref.dtype)


def _target_block_bytes() -> int:
    """Per-generation block-size target (bytes of output tile)."""
    try:
        kind = jax.devices()[0].device_kind.lower()
    except Exception:
        return 2 << 20
    # v5e: stay small so 2 streams x 2 buffers sits comfortably in scoped VMEM
    # and per-step overhead is already <10% at its ~0.8 TB/s HBM BW.
    if ("v5 lite" in kind) or ("v5e" in kind) or ("v5litepod" in kind):
        return 2 << 20
    # v6e / v7x: 4 MiB blocks (16 MiB total with double buffering) amortize the
    # ~0.35 us per-grid-step pipeline overhead at their higher HBM bandwidth.
    return 4 << 20


def frozen_batchnorm2d(x, weight, bias, running_mean, running_var, eps=1e-5,
                       donate_x: bool = False):
    """x: (N, C, H, W). weight/bias/running_*: (C,). Matches torch FrozenBatchNorm2d."""
    N, C, H, W = x.shape
    NC, HW = N * C, H * W

    # Per-channel affine coefficients in f32 (torch keeps these buffers in f32).
    w32 = weight.astype(jnp.float32)
    b32 = bias.astype(jnp.float32)
    rm32 = running_mean.astype(jnp.float32)
    rv32 = running_var.astype(jnp.float32)
    scale = w32 * lax.rsqrt(rv32 + eps)            # (C,)
    shift = b32 - rm32 * scale                     # (C,)

    # One packed (scale, shift) pair per (n, c) row of the flattened slab.
    params = jnp.stack(
        [jnp.broadcast_to(scale[None, :], (N, C)).reshape(NC),
         jnp.broadcast_to(shift[None, :], (N, C)).reshape(NC)],
        axis=-1,
    )                                              # (NC, 2) f32

    x2d = x.reshape(NC, HW)

    # Torch semantics: bf16/fp16 activations * f32 buffers promote to f32.
    out_dtype = jnp.promote_types(x.dtype, jnp.float32)

    # ---- tile sizing -------------------------------------------------------
    LANE, SUB = 128, 8
    in_item = jnp.dtype(x.dtype).itemsize
    out_item = jnp.dtype(out_dtype).itemsize

    # Lane-dense column tile (multiple of 128), capped; no explicit padding of
    # x — ragged edges are handled by the cdiv grid (masked edge writes).
    TW = min(_round_up(HW, LANE), 2048)
    bytes_per_row = TW * max(in_item, out_item)
    target = _target_block_bytes()
    target_rows = max(SUB, (target // bytes_per_row) // SUB * SUB)
    TR = min(_round_up(NC, SUB), target_rows, 2048)

    grid = (pl.cdiv(NC, TR), pl.cdiv(HW, TW))

    x_spec = pl.BlockSpec((TR, TW), lambda i, j: (i, j))
    p_spec = pl.BlockSpec((TR, 2), lambda i, j: (i, 0))   # constant over inner axis
    o_spec = pl.BlockSpec((TR, TW), lambda i, j: (i, j))

    # Aliasing only makes sense when in/out dtypes match and the caller donates x.
    aliases = {0: 0} if (donate_x and out_dtype == jnp.dtype(x.dtype)) else {}

    out2d = pl.pallas_call(
        _fbn_kernel,
        out_shape=jax.ShapeDtypeStruct((NC, HW), out_dtype),
        grid=grid,
        in_specs=[x_spec, p_spec],
        out_specs=o_spec,
        compiler_params=pltpu.CompilerParams(
            dimension_semantics=("parallel", "parallel"),
            # >= every generation's default; well under physical VMEM even on
            # v7x (64 MiB), and covers the 4 MiB-block case if a v5e is
            # misdetected (its physical VMEM is 128 MiB).
            vmem_limit_bytes=32 << 20,
        ),
        input_output_aliases=aliases,
    )(x2d, params)

    return out2d.reshape(N, C, H, W)


def _reference(x, weight, bias, running_mean, running_var, eps=1e-5):
    scale = (weight * lax.rsqrt(running_var + eps)).reshape(1, -1, 1, 1)
    shift = bias.reshape(1, -1, 1, 1) - running_mean.reshape(1, -1, 1, 1) * scale
    return x * scale + shift


if __name__ == "__main__":
    key = jax.random.PRNGKey(0)

    def make_case(k, N, C, H, W, dtype=jnp.float32):
        kx, kw, kb, km, kv = jax.random.split(k, 5)
        x = jax.random.normal(kx, (N, C, H, W), dtype=jnp.float32).astype(dtype)
        weight = (1.0 + 0.1 * jax.random.normal(kw, (C,))).astype(jnp.float32)
        bias = (0.1 * jax.random.normal(kb, (C,))).astype(jnp.float32)
        running_mean = (0.1 * jax.random.normal(km, (C,))).astype(jnp.float32)
        running_var = (1.0 + 0.1 * jnp.abs(jax.random.normal(kv, (C,)))).astype(
            jnp.float32
        )
        return x, weight, bias, running_mean, running_var

    k1, k2, k3 = jax.random.split(key, 3)

    # Case 1: lane-aligned shapes (HW multiple of 128).
    a1 = make_case(k1, 2, 4, 16, 16)
    o1 = jax.block_until_ready(frozen_batchnorm2d(*a1))
    r1 = _reference(*a1)
    assert o1.dtype == r1.dtype, "dtype mismatch (aligned case)"
    assert jnp.allclose(o1, r1, atol=1e-5, rtol=1e-5), "mismatch (aligned case)"

    # Case 2: Swin-stage-like odd spatial (7x7) and odd channel count -> ragged
    # edge blocks handled by the cdiv grid (no explicit pad/slice round trip).
    a2 = make_case(k2, 2, 3, 7, 7)
    o2 = jax.block_until_ready(frozen_batchnorm2d(*a2))
    r2 = _reference(*a2)
    assert jnp.allclose(o2, r2, atol=1e-5, rtol=1e-5), "mismatch (ragged case)"

    # Case 3: bf16 activations -> output promoted to f32 (torch FrozenBatchNorm2d
    # semantics: bf16 x * f32 buffers).
    a3 = make_case(k3, 2, 4, 16, 16, dtype=jnp.bfloat16)
    o3 = jax.block_until_ready(frozen_batchnorm2d(*a3))
    r3 = _reference(*a3).astype(jnp.float32)
    assert o3.dtype == jnp.float32, "bf16 input should produce f32 output"
    assert jnp.allclose(o3, r3, atol=1e-4, rtol=1e-4), "mismatch (bf16 case)"

    print("KERNEL_OK")
</pallas_src>

<mosaic_0001>
module attributes {stable_mosaic.version = 11 : i64} {
  func.func @_fbn_kernel(%arg0: i32, %arg1: i32, %arg2: memref<8x256xf32, #tpu.memory_space<vmem>>, %arg3: memref<8x2xf32, #tpu.memory_space<vmem>>, %arg4: memref<8x256xf32, #tpu.memory_space<vmem>>) attributes {dimension_semantics = [#tpu.dimension_semantics<parallel>, #tpu.dimension_semantics<parallel>], iteration_bounds = array<i64: 1, 1>, scalar_prefetch = 0 : i64, scratch_operands = 0 : i64, tpu.core_type = #tpu.core_type<tc>, window_params = [{transform_indices = @transform_0, window_bounds = array<i64: 8, 256>}, {transform_indices = @transform_1, window_bounds = array<i64: 8, 2>}, {transform_indices = @transform_2, window_bounds = array<i64: 8, 256>}]} {
    %c0 = arith.constant 0 : index
    %c0_0 = arith.constant 0 : index
    %0 = vector.load %arg2[%c0, %c0_0] : memref<8x256xf32, #tpu.memory_space<vmem>>, vector<8x256xf32>
    %c0_1 = arith.constant 0 : index
    %c0_2 = arith.constant 0 : index
    %1 = vector.load %arg3[%c0_1, %c0_2] : memref<8x2xf32, #tpu.memory_space<vmem>>, vector<8x2xf32>
    %2 = vector.extract_strided_slice %1 {offsets = [0, 0], sizes = [8, 1], strides = [1, 1]} : vector<8x2xf32> to vector<8x1xf32>
    %3 = vector.extract_strided_slice %1 {offsets = [0, 1], sizes = [8, 1], strides = [1, 1]} : vector<8x2xf32> to vector<8x1xf32>
    %4 = vector.broadcast %2 : vector<8x1xf32> to vector<8x256xf32>
    %5 = arith.mulf %0, %4 : vector<8x256xf32>
    %6 = vector.broadcast %3 : vector<8x1xf32> to vector<8x256xf32>
    %7 = arith.addf %5, %6 : vector<8x256xf32>
    %c0_3 = arith.constant 0 : index
    %c0_4 = arith.constant 0 : index
    %8 = vector.load %arg4[%c0_3, %c0_4] : memref<8x256xf32, #tpu.memory_space<vmem>>, vector<8x256xf32>
    tpu.vector_store %arg4[%c0_3, %c0_4], %7 {strides = array<i32>} : memref<8x256xf32, #tpu.memory_space<vmem>>, vector<8x256xf32>,
    return
  }
  func.func @transform_0(%arg0: i32, %arg1: i32) -> (i32, i32) {
    %c0_i32 = arith.constant 0 : i32
    return %arg0, %arg1 : i32, i32
  }
  func.func @transform_1(%arg0: i32, %arg1: i32) -> (i32, i32) {
    %c0_i32 = arith.constant 0 : i32
    %c0_i32_0 = arith.constant 0 : i32
    return %arg0, %c0_i32 : i32, i32
  }
  func.func @transform_2(%arg0: i32, %arg1: i32) -> (i32, i32) {
    %c0_i32 = arith.constant 0 : i32
    return %arg0, %arg1 : i32, i32
  }
}

</mosaic_0001>

<bundles_post_ra>
// kernel: tpu_custom_call.1
= control target key start
LH: loop header
LB: loop body
LE: loop exit
PB: predicated region body
PF: predicated region fallthrough
CT: control target
= control target key end

     0   :  { %7 = vsyncpa [#allocation3], 0  ;;  %s157_s0 = inlined_call_operand.hbm [shape: f32[8,256], index: 0, kind: input, shape index: {}]   ;;  %s158_s1 = inlined_call_operand.vmem [shape: f32[8,2], index: 1, kind: input, shape index: {}]   ;;  %s159_s2 = inlined_call_operand.hbm [shape: f32[8,256], index: 2, kind: output, shape index: {}]  }
   0x1   :  { %8 = vsyncpa [#allocation4], 0  ;;  %s111_s9 = smov [#allocation2]   ;;  %s63_s13 = scalar_lea.hbm %s157_s0, 256 }
   0x2   :  { %s15_s10 = sshll.u32 %s111_s9, 4  ;;  %p64_p0 = scmp.ne.s32.totalorder %s157_s0, %s63_s13  ;;  %s16_s10 = int_to_ptr.vmem [resolvable:$true] %s15_s10 }
   0x3   :  { %p67_p1 = scmp.lt.u32.totalorder %s63_s13, %s157_s0 }
   0x5   :  { %p69_p2 = pnand %p67_p1, %p64_p0 }
   0x7   :  { %72 = shalt.err (!%p69_p2)
}
   0x8   :  { %s73_s18 = scalar_lea.vmem %s16_s10, 256  ;;  %p78_p4 = scmp.lt.s32.totalorder %s16_s10, %s16_s10 }
   0x9   :  { %p74_p3 = scmp.ne.s32.totalorder %s16_s10, %s73_s18  ;;  %p79_p5 = scmp.lt.s32.totalorder %s73_s18, %s73_s18 }
   0xb   :  { %p80_p6 = por %p79_p5, %p78_p4 }
   0xd   :  { %p81_p7 = pnand %p80_p6, %p74_p3 }
   0xf   :  { %84 = shalt.err (!%p81_p7)
}
  0x10   :  { %18 = dma.hbm_to_vmem [thread:$0]  %s157_s0, 256, %s16_s10, [#allocation3]  }
  0x11   :  { %107 = dma.done.wait [#allocation3], 256  }
  0x12   :  { %108 = vsyncadd [#allocation3], 4294967040  ;;  %v112_v0 = vmov 0   ;;  %v26_v1 = vld [vmem:[%s158_s1] sm:$0xff]  ;;  %v113_v2 = vmov 1   ;;  %v25_v5 = vld [vmem:[#allocation2 + $0x8] sm:$0xff] }
  0x13   :  { %61 = vset.pattern.permute.xlu0 %v112_v0  ;;  %v24_v4 = vld [vmem:[#allocation2] sm:$0xff]  ;;  %s114_s23 = smov [#allocation5]  }
  0x14   :  { %29 = vperm.xlu0 %61, %v26_v1   ;;  %s48_s24 = sshll.u32 %s114_s23, 4  ;;  %s49_s24 = int_to_ptr.vmem [resolvable:$true] %s48_s24 }
  0x15   :  { %s85_s0 = scalar_lea.vmem %s49_s24, 256  ;;  %p90_p9 = scmp.lt.s32.totalorder %s49_s24, %s49_s24 }
  0x16   :  { %p86_p8 = scmp.ne.s32.totalorder %s49_s24, %s85_s0  ;;  %p91_p10 = scmp.lt.s32.totalorder %s85_s0, %s85_s0 }
  0x18   :  { %62 = vset.pattern.permute.xlu0 %v113_v2  ;;  %p92_p11 = por %p91_p10, %p90_p9 }
  0x19   :  { %35 = vperm.xlu0 %62, %v26_v1  }
  0x1a   :  { %p93_p12 = pnand %p92_p11, %p86_p8 }
  0x93   :  { %v30_v3 = vpop.permute.xlu0 %29 }
  0x94   :  { %v32_v6 = vmul.f32 %v30_v3, %v24_v4  ;;  %v33_v7 = vmul.f32 %v30_v3, %v25_v5 }
  0x98   :  { %v36_v8 = vpop.permute.xlu0 %35 }
  0x99   :  { %v38_v9 = vadd.f32 %v36_v8, %v32_v6  ;;  %v39_v10 = vadd.f32 %v36_v8, %v33_v7 }
  0x9b   :  { %40 = vst [vmem:[#allocation5] sm:$0xff] %v38_v9  ;;  %41 = vst [vmem:[#allocation5 + $0x8] sm:$0xff] %v39_v10 }
  0x9c   :  { %96 = shalt.err (!%p93_p12)
}
  0x9d   :  { %s97_s26 = scalar_lea.hbm %s159_s2, 256 }
  0x9e   :  { %p98_p13 = scmp.ne.s32.totalorder %s159_s2, %s97_s26  ;;  %p101_p0 = scmp.lt.u32.totalorder %s97_s26, %s159_s2 }
  0xa0   :  { %p103_p1 = pnand %p101_p0, %p98_p13 }
  0xa2   :  { %106 = shalt.err (!%p103_p1)
}
  0xa3   :  { %51 = dma.vmem_to_hbm [thread:$0]  %s49_s24, 256, %s159_s2, [#allocation4]  }
  0xa4   :  { %109 = dma.done.wait [#allocation4], 256  }
  0xa5   :  { %110 = vsyncadd [#allocation4], 4294967040 }
  0xa6   :  { %55 = vsyncpa [#allocation3], 1 }
  0xa7   :  { %56 = vsyncpa [#allocation4], 1 }

</bundles_post_ra>
